<compile_context>
chip_gen: v7x
topology: tpu7x:2x2x1
jax: 0.10.0
libtpu: 0.0.40
codegen_flags: <defaults>
</compile_context>

<pallas_src>
import jax
import jax.numpy as jnp
from jax.experimental import pallas as pl
from jax.experimental.pallas import tpu as pltpu

NEG_SLOPE = 0.01          # nn.LeakyReLU default negative_slope
BN_EPS = 1e-5             # nn.BatchNorm2d default eps
ACT_DTYPE = jnp.bfloat16  # inter-layer activation / weight storage dtype
TM_MAX = 512              # row-tile cap (sublane dim of the GEMM)
TN_MAX = 256              # output-channel tile cap (lane dim)
VMEM_LIMIT = 32 * 1024 * 1024


# ----------------------------------------------------------------------------
# Pallas kernels: matmul + bias + LeakyReLU (+ optional fused residual add)
# ----------------------------------------------------------------------------
def _conv_kernel(a_ref, w_ref, b_ref, o_ref):
    acc = jnp.dot(a_ref[...], w_ref[...], preferred_element_type=jnp.float32)
    y = acc + b_ref[...]                              # (1, TN) broadcasts
    o_ref[...] = jnp.where(y >= 0, y, NEG_SLOPE * y).astype(o_ref.dtype)


def _conv_res_kernel(a_ref, w_ref, b_ref, r_ref, o_ref):
    acc = jnp.dot(a_ref[...], w_ref[...], preferred_element_type=jnp.float32)
    y = acc + b_ref[...]
    y = jnp.where(y >= 0, y, NEG_SLOPE * y) + r_ref[...].astype(jnp.float32)
    o_ref[...] = y.astype(o_ref.dtype)


def _pick_tile(dim, max_tile, unit):
    """Largest legal tile <= max_tile for this dim.

    Whole dim (no padding) if it fits, else the largest multiple of `unit`
    that divides it, else max_tile (operand gets zero-padded)."""
    if dim <= max_tile:
        return dim
    t = (max_tile // unit) * unit
    while t >= unit:
        if dim % t == 0:
            return t
        t -= unit
    return (max_tile // unit) * unit


def matmul_bias_lrelu(a, w, b, residual=None, out_dtype=ACT_DTYPE):
    """LeakyReLU(a @ w + b) [+ residual].  a:[M,K] bf16, w:[K,N] bf16, b:[N] f32."""
    M, K = a.shape
    _, N = w.shape

    tm = _pick_tile(M, TM_MAX, 8)
    tn = _pick_tile(N, TN_MAX, 128)
    # If the row grid collapses to a single tile, split the channel grid so
    # both TensorCores (v7x megacore) still get work.
    if pl.cdiv(M, tm) == 1 and tn == N and N >= 256 and (N // 2) % 128 == 0:
        tn = N // 2

    mp = pl.cdiv(M, tm) * tm
    np_ = pl.cdiv(N, tn) * tn
    if mp != M:
        a = jnp.pad(a, ((0, mp - M), (0, 0)))
        if residual is not None:
            residual = jnp.pad(residual, ((0, mp - M), (0, 0)))
    if np_ != N:
        w = jnp.pad(w, ((0, 0), (0, np_ - N)))
        b = jnp.pad(b, ((0, np_ - N),))
        if residual is not None:
            residual = jnp.pad(residual, ((0, 0), (0, np_ - N)))
    bias2d = b.reshape(1, np_).astype(jnp.float32)

    in_specs = [
        pl.BlockSpec((tm, K), lambda i, j: (i, 0)),   # full-K block: no K grid
        pl.BlockSpec((K, tn), lambda i, j: (0, j)),
        pl.BlockSpec((1, tn), lambda i, j: (0, j)),
    ]
    args = [a, w, bias2d]
    kernel = _conv_kernel
    if residual is not None:
        in_specs.append(pl.BlockSpec((tm, tn), lambda i, j: (i, j)))
        args.append(residual)
        kernel = _conv_res_kernel

    out = pl.pallas_call(
        kernel,
        out_shape=jax.ShapeDtypeStruct((mp, np_), out_dtype),
        grid_spec=pltpu.PrefetchScalarGridSpec(
            num_scalar_prefetch=0,
            grid=(mp // tm, np_ // tn),
            in_specs=in_specs,
            out_specs=pl.BlockSpec((tm, tn), lambda i, j: (i, j)),
        ),
        compiler_params=pltpu.CompilerParams(
            dimension_semantics=("parallel", "parallel"),
            vmem_limit_bytes=VMEM_LIMIT),
    )(*args)
    if mp != M or np_ != N:
        out = out[:M, :N]
    return out


# ----------------------------------------------------------------------------
# ConvBlock = Conv2d + BN(eval, folded) + LeakyReLU, via im2col + Pallas matmul
# ----------------------------------------------------------------------------
def im2col(x, k, stride, pad):
    """x: [N, H, W, C] -> ([N*Ho*Wo, k*k*C], (N, Ho, Wo)); patch order (kh,kw,C)."""
    N, H, W, C = x.shape
    Ho = (H + 2 * pad - k) // stride + 1
    Wo = (W + 2 * pad - k) // stride + 1
    if pad > 0:
        x = jnp.pad(x, ((0, 0), (pad, pad), (pad, pad), (0, 0)))
    cols = []
    for i in range(k):
        for j in range(k):
            cols.append(x[:, i:i + stride * Ho:stride, j:j + stride * Wo:stride, :])
    patches = jnp.concatenate(cols, axis=-1)
    return patches.reshape(N * Ho * Wo, k * k * C), (N, Ho, Wo)


def apply_conv_block(x, params, k, stride, pad, residual=None, out_dtype=ACT_DTYPE):
    w, b = params                       # w: [k*k*Cin, Cout] bf16 (BN folded), b: f32
    if k == 1 and stride == 1 and pad == 0:
        N, H, W, C = x.shape
        patches, shape = x.reshape(N * H * W, C), (N, H, W)
    else:
        patches, shape = im2col(x, k, stride, pad)
    N, Ho, Wo = shape
    cout = w.shape[1]
    res2d = None
    if residual is not None:
        res2d = residual.reshape(N * Ho * Wo, cout)
    out = matmul_bias_lrelu(patches, w, b, residual=res2d, out_dtype=out_dtype)
    return out.reshape(N, Ho, Wo, cout)


# ----------------------------------------------------------------------------
# Deterministic parameter construction (BatchNorm folded into conv)
# ----------------------------------------------------------------------------
class KeyGen:
    def __init__(self, seed):
        self.key = jax.random.PRNGKey(seed)

    def __call__(self):
        self.key, sub = jax.random.split(self.key)
        return sub


def init_conv_block(key, cin, cout, k):
    k_w, k_b, k_g, k_be, k_m, k_v = jax.random.split(key, 6)
    fan_in = cin * k * k
    bound = (6.0 / fan_in) ** 0.5
    w = jax.random.uniform(k_w, (k * k * cin, cout), jnp.float32, -bound, bound)
    conv_b = jax.random.uniform(k_b, (cout,), jnp.float32, -bound, bound)
    gamma = 1.0 + 0.1 * jax.random.normal(k_g, (cout,), jnp.float32)
    beta = 0.1 * jax.random.normal(k_be, (cout,), jnp.float32)
    mean = 0.1 * jax.random.normal(k_m, (cout,), jnp.float32)
    var = jax.random.uniform(k_v, (cout,), jnp.float32, 0.5, 1.5)
    scale = gamma / jnp.sqrt(var + BN_EPS)
    w_folded = (w * scale[None, :]).astype(ACT_DTYPE)          # bf16 weights
    b_folded = (conv_b - mean) * scale + beta                  # f32 bias
    return (w_folded, b_folded)


# --------------------------- Darknet53 ---------------------------------------
def build_darknet(kg, in_channel):
    params = {"head": init_conv_block(kg(), in_channel, 32, 3), "res": []}
    for c, n in [(32, 1), (64, 2), (128, 8), (256, 8), (512, 4)]:
        blocks = [(init_conv_block(kg(), c, c // 2, 1),
                   init_conv_block(kg(), c // 2, c, 3)) for _ in range(n)]
        down = init_conv_block(kg(), c, c * 2, 3)
        params["res"].append((blocks, down))
    return params


def apply_darknet(params, x):
    x = apply_conv_block(x, params["head"], 3, 1, 1)
    outs = []
    for blocks, down in params["res"]:
        for p1, p2 in blocks:
            r = apply_conv_block(x, p1, 1, 1, 0)
            # residual add fused into the 3x3 conv epilogue
            x = apply_conv_block(r, p2, 3, 1, 1, residual=x)
        x = apply_conv_block(x, down, 3, 2, 1)
        outs.append(x)
    return outs[2], outs[3], outs[4]          # y_256, y_512, y_1024


# --------------------------- YoloBlock ---------------------------------------
def build_connect(kg, cin, cout):
    return [init_conv_block(kg(), cin, cout, 1),
            init_conv_block(kg(), cout, cout, 1),
            init_conv_block(kg(), cout, cout * 2, 3),
            init_conv_block(kg(), cout * 2, cout, 1)]


def apply_connect(ps, x):
    x = apply_conv_block(x, ps[0], 1, 1, 0)
    x = apply_conv_block(x, ps[1], 1, 1, 0)
    x = apply_conv_block(x, ps[2], 3, 1, 1)
    return apply_conv_block(x, ps[3], 1, 1, 0)


def build_feature(kg, cin, cout):
    return [init_conv_block(kg(), cin, cin * 2, 3),
            init_conv_block(kg(), cin * 2, cout, 1)]


def apply_feature(ps, x):
    x = apply_conv_block(x, ps[0], 3, 1, 1)
    return apply_conv_block(x, ps[1], 1, 1, 0, out_dtype=jnp.float32)


def build_upsample(kg, cin):
    return init_conv_block(kg(), cin, cin // 2, 1)


def apply_upsample(p, x):
    x = apply_conv_block(x, p, 1, 1, 0)
    return jnp.repeat(jnp.repeat(x, 2, axis=1), 2, axis=2)   # nearest, scale 2


def build_yoloblock(kg, classes_num, anchor_num):
    fc = anchor_num * (4 + 1 + classes_num)
    return {
        "c1024": build_connect(kg, 1024, 512),
        "f1024": build_feature(kg, 512, fc),
        "u1024": build_upsample(kg, 512),
        "c512": build_connect(kg, 512 + 256, (512 + 256) // 3),
        "f512": build_feature(kg, 256, fc),
        "u512": build_upsample(kg, 256),
        "c256": build_connect(kg, 256 + 128, (256 + 128) // 3),
        "f256": build_feature(kg, 128, fc),
    }


def apply_yoloblock(p, feats):
    x256, x512, x1024 = feats
    x1024 = apply_connect(p["c1024"], x1024)
    fm1024 = apply_feature(p["f1024"], x1024)
    x1024 = apply_upsample(p["u1024"], x1024)
    x512 = jnp.concatenate([x1024, x512], axis=-1)
    x512 = apply_connect(p["c512"], x512)
    fm512 = apply_feature(p["f512"], x512)
    x512 = apply_upsample(p["u512"], x512)
    x256 = jnp.concatenate([x512, x256], axis=-1)
    x256 = apply_connect(p["c256"], x256)
    fm256 = apply_feature(p["f256"], x256)
    return [fm256, fm512, fm1024]


# --------------------------- Yolo3 --------------------------------------------
def build_yolo3(seed, in_channel, classes_num, anchor_num):
    kg = KeyGen(seed)
    return {"darknet": build_darknet(kg, in_channel),
            "yolo": build_yoloblock(kg, classes_num, anchor_num)}


def yolo3_forward(params, x_nchw):
    x = jnp.transpose(x_nchw, (0, 2, 3, 1)).astype(ACT_DTYPE)   # NCHW -> NHWC bf16
    feats = apply_darknet(params["darknet"], x)
    fms = apply_yoloblock(params["yolo"], feats)
    return [jnp.transpose(f, (0, 3, 1, 2)).astype(jnp.float32) for f in fms]


if __name__ == "__main__":
    in_channel, classes_num, anchor_num = 3, 2, 3
    N, H, W = 2, 32, 32                                     # H,W must be multiples of 32

    params = build_yolo3(0, in_channel, classes_num, anchor_num)
    x = jax.random.normal(jax.random.PRNGKey(0), (N, in_channel, H, W), jnp.float32)

    fm256, fm512, fm1024 = yolo3_forward(params, x)
    jax.block_until_ready((fm256, fm512, fm1024))

    fc = anchor_num * (4 + 1 + classes_num)
    assert fm256.shape == (N, fc, H // 8, W // 8)
    assert fm512.shape == (N, fc, H // 16, W // 16)
    assert fm1024.shape == (N, fc, H // 32, W // 32)
    assert all(bool(jnp.isfinite(f).all()) for f in (fm256, fm512, fm1024))
    print("KERNEL_OK")
</pallas_src>

<mosaic_0001>
module attributes {stable_mosaic.version = 11 : i64} {
  func.func @_conv_kernel(%arg0: i32, %arg1: i32, %arg2: memref<512x27xbf16, #tpu.memory_space<vmem>>, %arg3: memref<27x32xbf16, #tpu.memory_space<vmem>>, %arg4: memref<1x32xf32, #tpu.memory_space<vmem>>, %arg5: memref<512x32xbf16, #tpu.memory_space<vmem>>) attributes {dimension_semantics = [#tpu.dimension_semantics<parallel>, #tpu.dimension_semantics<parallel>], iteration_bounds = array<i64: 4, 1>, scalar_prefetch = 0 : i64, scratch_operands = 0 : i64, tpu.core_type = #tpu.core_type<tc>, window_params = [{transform_indices = @transform_0, window_bounds = array<i64: 512, 27>}, {transform_indices = @transform_1, window_bounds = array<i64: 27, 32>}, {transform_indices = @transform_2, window_bounds = array<i64: 1, 32>}, {transform_indices = @transform_3, window_bounds = array<i64: 512, 32>}]} {
    %c0 = arith.constant 0 : index
    %c0_0 = arith.constant 0 : index
    %0 = vector.load %arg2[%c0, %c0_0] : memref<512x27xbf16, #tpu.memory_space<vmem>>, vector<512x27xbf16>
    %c0_1 = arith.constant 0 : index
    %c0_2 = arith.constant 0 : index
    %1 = vector.load %arg3[%c0_1, %c0_2] : memref<27x32xbf16, #tpu.memory_space<vmem>>, vector<27x32xbf16>
    %cst = arith.constant dense<0.000000e+00> : vector<512x32xf32>
    %2 = tpu.matmul %0, %1, %cst {dimension_numbers = #tpu.dot_dimension_numbers<[1], [0], [0], [1], [0, 0, 1, 1], [], []>} : vector<512x27xbf16>, vector<27x32xbf16>, vector<512x32xf32> -> vector<512x32xf32>
    %c0_3 = arith.constant 0 : index
    %c0_4 = arith.constant 0 : index
    %3 = vector.load %arg4[%c0_3, %c0_4] : memref<1x32xf32, #tpu.memory_space<vmem>>, vector<1x32xf32>
    %4 = vector.broadcast %3 : vector<1x32xf32> to vector<512x32xf32>
    %5 = arith.addf %2, %4 : vector<512x32xf32>
    %cst_5 = arith.constant 0.000000e+00 : f32
    %6 = vector.broadcast %cst_5 : f32 to vector<512x32xf32>
    %7 = arith.cmpf oge, %5, %6 : vector<512x32xf32>
    %cst_6 = arith.constant 0.00999999977 : f32
    %8 = vector.broadcast %cst_6 : f32 to vector<512x32xf32>
    %9 = arith.mulf %8, %5 : vector<512x32xf32>
    %10 = arith.select %7, %5, %9 : vector<512x32xi1>, vector<512x32xf32>
    %11 = arith.truncf %10 : vector<512x32xf32> to vector<512x32xbf16>
    %c0_7 = arith.constant 0 : index
    %c0_8 = arith.constant 0 : index
    %12 = vector.load %arg5[%c0_7, %c0_8] : memref<512x32xbf16, #tpu.memory_space<vmem>>, vector<512x32xbf16>
    tpu.vector_store %arg5[%c0_7, %c0_8], %11 {strides = array<i32>} : memref<512x32xbf16, #tpu.memory_space<vmem>>, vector<512x32xbf16>,
    return
  }
  func.func @transform_0(%arg0: i32, %arg1: i32) -> (i32, i32) {
    %c0_i32 = arith.constant 0 : i32
    %c0_i32_0 = arith.constant 0 : i32
    return %arg0, %c0_i32 : i32, i32
  }
  func.func @transform_1(%arg0: i32, %arg1: i32) -> (i32, i32) {
    %c0_i32 = arith.constant 0 : i32
    %c0_i32_0 = arith.constant 0 : i32
    return %c0_i32, %arg1 : i32, i32
  }
  func.func @transform_2(%arg0: i32, %arg1: i32) -> (i32, i32) {
    %c0_i32 = arith.constant 0 : i32
    %c0_i32_0 = arith.constant 0 : i32
    return %c0_i32, %arg1 : i32, i32
  }
  func.func @transform_3(%arg0: i32, %arg1: i32) -> (i32, i32) {
    %c0_i32 = arith.constant 0 : i32
    return %arg0, %arg1 : i32, i32
  }
}

</mosaic_0001>

<bundles_post_ra>
// kernel: tpu_custom_call.1
= control target key start
LH: loop header
LB: loop body
LE: loop exit
PB: predicated region body
PF: predicated region fallthrough
CT: control target
= control target key end

     0   :  { %s1898_s12 = smov 0   ;;  %s1900_s13 = smov 0   ;;  %s2274_s0 = inlined_call_operand.vmem [shape: bf16[2048,27], index: 0, kind: input, shape index: {}]   ;;  %s2275_s1 = inlined_call_operand.vmem [shape: bf16[27,32], index: 1, kind: input, shape index: {}]   ;;  %s2276_s2 = inlined_call_operand.vmem [shape: f32[1,32], index: 2, kind: input, shape index: {}]   ;;  %s2277_s3 = inlined_call_operand.vmem [shape: bf16[2048,32], index: 3, kind: output, shape index: {}]  }
   0x1   :  { %s1902_s14 = smov 0  }
   0x2 LB: > { %s25_s15 = sadd.s32 1, %s1871_s13  ;;  %p1486_p0 = scmp.ge.s32.totalorder %s1875_s14, 1  ;;  %s1875_s14 = sphi %s1902_s14, %s13_s14   ;;  %s1871_s13 = sphi %s1900_s13, %s2279_s13   ;;  %s1867_s12 = sphi %s1898_s12, %s2278_s12  }
   0x3   : > { %p27_p1 = scmp.ge.s32.totalorder %s25_s15, 4  ;;  %p169_p2 = scmp.lt.s32.totalorder %s1875_s14, 5 }
   0x5   : > { %s2281_s15 = smov (%p27_p1, %s25_s15), 0  ;;  %p170_p3 = pnand %p1486_p0, %p169_p2 }
   0x6   : > { %v1819_v0 = vld [vmem:[%s2275_s1] sm:$0xff] (!%p170_p3)   ;;  %vm569_vm0 = vcmask (!%p170_p3), 1044480   ;;  %v1820_v1 = vld [vmem:[%s2275_s1 + $0x8] sm:$0x3f] (!%p170_p3)   ;;  %vm570_vm1 = vcmask (!%p170_p3), 1045504   ;;  %s1487_s20 = sshll.u32 (!%p170_p3), %s1867_s12, 6 }
   0x7   : > { %173 = sbr.rel (%p170_p3) target bundleno = 318 (0x13e), region = 32  ;;  %1722 = vmatprep.subr.bf16.mxu0 (!%p170_p3), %v1819_v0  ;;  %1790 = vmatprep.subr.bf16.mxu1 (!%p170_p3), %v1819_v0  ;;  %v1877_v2 = vmov (!%p170_p3), 65535   ;;  %p204_p4 = scmp.lt.s32.totalorder (!%p170_p3), %s1487_s20, 255  ;;  %vm472_vm2 = vcmask (!%p170_p3), 220160   ;;  %v1999_v38 = vld [vmem:[%s2276_s2] ss:$0 sm:$0xff] (!%p170_p3) }
   0x8   : > { %1723 = vmatpush3.bf16.msra.mxu0 (!%p170_p3), %v1819_v0  ;;  %1792 = vmatpush3.bf16.msra.mxu1 (!%p170_p3), %v1819_v0  ;;  %v571_v3 = vsel (!%p170_p3), %vm569_vm0, 4294967295, %v1877_v2  ;;  %vm1313_vm3 = vcmask (!%p170_p3), 257024  }
   0x9   : > { %v572_v4 = vsel (!%p170_p3), %vm570_vm1, %v571_v3, 0 }
   0xa   : > { %v574_v5 = vand.u32 (!%p170_p3), %v1820_v1, %v572_v4 }
   0xc   : > { %1724 = vmatprep.subr.bf16.mxu0 (!%p170_p3), %v574_v5  ;;  %1791 = vmatprep.subr.bf16.mxu1 (!%p170_p3), %v574_v5 }
   0xd   : > { %1725 = vmatpush3.bf16.msra.mxu0 (!%p170_p3), %v574_v5  ;;  %1793 = vmatpush3.bf16.msra.mxu1 (!%p170_p3), %v574_v5 }
   0xe   : > { %s2283_s20 = smov (!%p204_p4, %s1487_s20), 255 }
   0xf   : > { %s1488_s21 = sshll.u32 %s2283_s20, 2 }
  0x10   : > { %s1930_s24 = scalar_lea.vmem %s2274_s0, %s1488_s21  ;;  %s2011_s29 = scalar_lea.vmem %s2277_s3, %s1488_s21 }
  0x11   : > { %v1821_v6 = vld [vmem:[%s1930_s24] sm:$0xff]   ;;  %v1823_v8 = vld [vmem:[%s1930_s24 + $0x8] sm:$0xff]   ;;  %v1825_v10 = vld [vmem:[%s1930_s24 + $0x10] sm:$0xff]  }
  0x12   : > { %v1822_v7 = vld [vmem:[%s1930_s24 + $0x80] sm:$0xff]   ;;  %1726 = vmatprep.mubr.msk.bf16.mxu0 %vm472_vm2, %v1821_v6  ;;  %v1824_v9 = vld [vmem:[%s1930_s24 + $0x88] sm:$0xff]   ;;  %v1826_v11 = vld [vmem:[%s1930_s24 + $0x90] sm:$0xff]  }
  0x13   : > { %1758 = vmatprep.mubr.msk.bf16.mxu1 %vm472_vm2, %v1822_v7  ;;  %1727 = vmatmul.mubr.msk.bf16.vlgmr.msra.gmra.mrb[0].mxu0 %vm472_vm2, %v1823_v8  ;;  %v1827_v12 = vld [vmem:[%s1930_s24 + $0x18] sm:$0xff]   ;;  %v1829_v14 = vld [vmem:[%s1930_s24 + $0x20] sm:$0xff]   ;;  %v1831_v16 = vld [vmem:[%s1930_s24 + $0x28] sm:$0xff]  }
  0x14   : > { %1759 = vmatmul.mubr.msk.bf16.vlgmr.msra.gmra.mrb[0].mxu1 %vm472_vm2, %v1824_v9  ;;  %1730 = vmatprep.mubr.msk.bf16.mxu0 %vm472_vm2, %v1825_v10  ;;  %v1828_v13 = vld [vmem:[%s1930_s24 + $0x98] sm:$0xff]   ;;  %v1830_v15 = vld [vmem:[%s1930_s24 + $0xa0] sm:$0xff]   ;;  %v1832_v17 = vld [vmem:[%s1930_s24 + $0xa8] sm:$0xff]  }
  0x15   : > { %1762 = vmatprep.mubr.msk.bf16.mxu1 %vm472_vm2, %v1826_v11  ;;  %v1833_v18 = vld [vmem:[%s1930_s24 + $0x30] sm:$0xff]   ;;  %v1835_v20 = vld [vmem:[%s1930_s24 + $0x38] sm:$0xff]   ;;  %v1837_v22 = vld [vmem:[%s1930_s24 + $0x40] sm:$0xff]  }
  0x16   : > { %v1834_v19 = vld [vmem:[%s1930_s24 + $0xb0] sm:$0xff]   ;;  %v1836_v21 = vld [vmem:[%s1930_s24 + $0xb8] sm:$0xff]   ;;  %v1838_v23 = vld [vmem:[%s1930_s24 + $0xc0] sm:$0xff]  }
  0x17   : > { %v1839_v24 = vld [vmem:[%s1930_s24 + $0x48] sm:$0xff]   ;;  %v1841_v26 = vld [vmem:[%s1930_s24 + $0x50] sm:$0xff]   ;;  %v1843_v28 = vld [vmem:[%s1930_s24 + $0x58] sm:$0xff]  }
  0x18   : > { %v1840_v25 = vld [vmem:[%s1930_s24 + $0xc8] sm:$0xff]   ;;  %v1842_v27 = vld [vmem:[%s1930_s24 + $0xd0] sm:$0xff]   ;;  %v1844_v29 = vld [vmem:[%s1930_s24 + $0xd8] sm:$0xff]  }
  0x19   : > { %v1845_v30 = vld [vmem:[%s1930_s24 + $0x60] sm:$0xff]   ;;  %v1847_v32 = vld [vmem:[%s1930_s24 + $0x68] sm:$0xff]   ;;  %v1849_v34 = vld [vmem:[%s1930_s24 + $0x70] sm:$0xff]  }
  0x1a   : > { %v1846_v31 = vld [vmem:[%s1930_s24 + $0xe0] sm:$0xff]   ;;  %v1848_v33 = vld [vmem:[%s1930_s24 + $0xe8] sm:$0xff]   ;;  %v1850_v35 = vld [vmem:[%s1930_s24 + $0xf0] sm:$0xff]  }
  0x1b   : > { %1731 = vmatmul.mubr.msk.bf16.gmra.mrb[4].mxu0 %vm472_vm2, %v1827_v12  ;;  %v1851_v36 = vld [vmem:[%s1930_s24 + $0x78] sm:$0xff]  }
  0x1c   : > { %1763 = vmatmul.mubr.msk.bf16.gmra.mrb[4].mxu1 %vm472_vm2, %v1828_v13  ;;  %1734 = vmatprep.mubr.msk.bf16.mxu0 %vm472_vm2, %v1829_v14  ;;  %v1852_v37 = vld [vmem:[%s1930_s24 + $0xf8] sm:$0xff]  }
  0x1d   : > { %1766 = vmatprep.mubr.msk.bf16.mxu1 %vm472_vm2, %v1830_v15 }
  0x23   : > { %1735 = vmatmul.mubr.msk.bf16.gmra.mrb[8].mxu0 %vm472_vm2, %v1831_v16 }
  0x24   : > { %1767 = vmatmul.mubr.msk.bf16.gmra.mrb[8].mxu1 %vm472_vm2, %v1832_v17  ;;  %1738 = vmatprep.mubr.msk.bf16.mxu0 %vm472_vm2, %v1833_v18 }
  0x25   : > { %1770 = vmatprep.mubr.msk.bf16.mxu1 %vm472_vm2, %v1834_v19 }
  0x2b   : > { %1739 = vmatmul.mubr.msk.bf16.gmra.mrb[12].mxu0 %vm472_vm2, %v1835_v20 }
  0x2c   : > { %1771 = vmatmul.mubr.msk.bf16.gmra.mrb[12].mxu1 %vm472_vm2, %v1836_v21  ;;  %1742 = vmatprep.mubr.msk.bf16.mxu0 %vm472_vm2, %v1837_v22 }
  0x2d   : > { %1774 = vmatprep.mubr.msk.bf16.mxu1 %vm472_vm2, %v1838_v23 }
  0x33   : > { %1743 = vmatmul.mubr.msk.bf16.gmra.mrb[16].mxu0 %vm472_vm2, %v1839_v24 }
  0x34   : > { %1775 = vmatmul.mubr.msk.bf16.gmra.mrb[16].mxu1 %vm472_vm2, %v1840_v25  ;;  %1746 = vmatprep.mubr.msk.bf16.mxu0 %vm472_vm2, %v1841_v26 }
  0x35   : > { %1778 = vmatprep.mubr.msk.bf16.mxu1 %vm472_vm2, %v1842_v27 }
  0x3b   : > { %1747 = vmatmul.mubr.msk.bf16.gmra.mrb[20].mxu0 %vm472_vm2, %v1843_v28 }
  0x3c   : > { %1779 = vmatmul.mubr.msk.bf16.gmra.mrb[20].mxu1 %vm472_vm2, %v1844_v29  ;;  %1750 = vmatprep.mubr.msk.bf16.mxu0 %vm472_vm2, %v1845_v30 }
  0x3d   : > { %1782 = vmatprep.mubr.msk.bf16.mxu1 %vm472_vm2, %v1846_v31 }
  0x43   : > { %1751 = vmatmul.mubr.msk.bf16.gmra.mrb[24].mxu0 %vm472_vm2, %v1847_v32 }
  0x44   : > { %1783 = vmatmul.mubr.msk.bf16.gmra.mrb[24].mxu1 %vm472_vm2, %v1848_v33  ;;  %1754 = vmatprep.mubr.msk.bf16.mxu0 %vm472_vm2, %v1849_v34 }
  0x45   : > { %1786 = vmatprep.mubr.msk.bf16.mxu1 %vm472_vm2, %v1850_v35 }
  0x4b   : > { %1755 = vmatmul.mubr.msk.bf16.gmra.mrb[28].mxu0 %vm472_vm2, %v1851_v36 }
  0x4c   : > { %1787 = vmatmul.mubr.msk.bf16.gmra.mrb[28].mxu1 %vm472_vm2, %v1852_v37 }
  0xe6   : > { %v1728_v39 = vpop.f32.mrb[0].mxu0 }
  0xe7   : > { %v619_v40 = vadd.f32 %v1728_v39, %v1999_v38  ;;  %v1760_v41 = vpop.f32.mrb[0].mxu1  ;;  %v610_v42 = vpop.f32.mrb[1].mxu0 }
  0xe8   : > { %v747_v43 = vadd.f32 %v1760_v41, %v1999_v38  ;;  %v611_v44 = vadd.f32 %v1999_v38, %v610_v42  ;;  %v738_v45 = vpop.f32.mrb[1].mxu1  ;;  %v1729_v46 = vpop.f32.mrb[2].mxu0 }
  0xe9   : > { %vm867_vm4 = vcmp.ge.f32.partialorder %v619_v40, 0.0  ;;  %v931_v47 = vmul.f32 0.01, %v619_v40  ;;  %v739_v48 = vadd.f32 %v1999_v38, %v738_v45  ;;  %v622_v49 = vadd.f32 %v1729_v46, %v1999_v38  ;;  %v1761_v50 = vpop.f32.mrb[2].mxu1  ;;  %v613_v51 = vpop.f32.mrb[3].mxu0 }
  0xea   : > { %vm899_vm5 = vcmp.ge.f32.partialorder %v747_v43, 0.0  ;;  %v963_v52 = vmul.f32 0.01, %v747_v43  ;;  %vm865_vm6 = vcmp.ge.f32.partialorder %v611_v44, 0.0  ;;  %v929_v53 = vmul.f32 0.01, %v611_v44 }
  0xeb   : > { %v995_v54 = vsel %vm867_vm4, %v619_v40, %v931_v47  ;;  %vm897_vm7 = vcmp.ge.f32.partialorder %v739_v48, 0.0  ;;  %v961_v55 = vmul.f32 0.01, %v739_v48  ;;  %vm868_vm8 = vcmp.ge.f32.partialorder %v622_v49, 0.0  ;;  %v741_v56 = vpop.f32.mrb[3].mxu1 }
  0xec   : > { %v1626_v57 = vpack.c.bf16 %v995_v54, %v995_v54  ;;  %v1027_v58 = vsel %vm899_vm5, %v747_v43, %v963_v52  ;;  %v993_v59 = vsel %vm865_vm6, %v611_v44, %v929_v53  ;;  %v932_v60 = vmul.f32 0.01, %v622_v49 }
  0xed   : > { %v1658_v61 = vpack.c.bf16 %v1027_v58, %v1027_v58  ;;  %v1624_v62 = vpack.c.bf16 %v993_v59, %v993_v59  ;;  %v1025_v63 = vsel %vm897_vm7, %v739_v48, %v961_v55  ;;  %v750_v0 = vadd.f32 %v1761_v50, %v1999_v38 }
  0xee   : > { %1316 = vst.msk [vmem:[%s2011_s29 + $0x8] sm:$0xf] %vm1313_vm3, %v1626_v57  ;;  %v1656_v1 = vpack.c.bf16 %v1025_v63, %v1025_v63  ;;  %v996_v2 = vsel %vm868_vm8, %v622_v49, %v932_v60  ;;  %v614_v3 = vadd.f32 %v1999_v38, %v613_v51  ;;  %v742_v4 = vadd.f32 %v1999_v38, %v741_v56  ;;  %v1732_v5 = vpop.f32.mrb[4].mxu0 }
  0xef   : > { %1348 = vst.msk [vmem:[%s2011_s29 + $0x88] sm:$0xf] %vm1313_vm3, %v1658_v61  ;;  %1314 = vst.msk [vmem:[%s2011_s29] sm:$0xf] %vm1313_vm3, %v1624_v62  ;;  %v1627_v6 = vpack.c.bf16 %v996_v2, %v996_v2  ;;  %vm900_vm9 = vcmp.ge.f32.partialorder %v750_v0, 0.0  ;;  %v635_v8 = vadd.f32 %v1732_v5, %v1999_v38  ;;  %v1764_v9 = vpop.f32.mrb[4].mxu1 }
  0xf0   : > { %v964_v7 = vmul.f32 0.01, %v750_v0  ;;  %v626_v10 = vpop.f32.mrb[5].mxu0  ;;  %1346 = vst.msk [vmem:[%s2011_s29 + $0x80] sm:$0xf] %vm1313_vm3, %v1656_v1  ;;  %vm866_vm10 = vcmp.ge.f32.partialorder %v614_v3, 0.0  ;;  %v763_v15 = vadd.f32 %v1764_v9, %v1999_v38 }
  0xf1   : > { %v930_v11 = vmul.f32 0.01, %v614_v3  ;;  %vm898_vm11 = vcmp.ge.f32.partialorder %v742_v4, 0.0  ;;  %v962_v12 = vmul.f32 0.01, %v742_v4  ;;  %vm871_vm12 = vcmp.ge.f32.partialorder %v635_v8, 0.0 }
  0xf2   : > { %1317 = vst.msk [vmem:[%s2011_s29 + $0xc] sm:$0xf] %vm1313_vm3, %v1627_v6  ;;  %v1028_v13 = vsel %vm900_vm9, %v750_v0, %v964_v7  ;;  %v935_v14 = vmul.f32 0.01, %v635_v8  ;;  %v754_v16 = vpop.f32.mrb[5].mxu1  ;;  %v1733_v17 = vpop.f32.mrb[6].mxu0  ;;  %v627_v21 = vadd.f32 %v1999_v38, %v626_v10 }
  0xf3   : > { %v1659_v18 = vpack.c.bf16 %v1028_v13, %v1028_v13  ;;  %v994_v19 = vsel %vm866_vm10, %v614_v3, %v930_v11  ;;  %v1026_v20 = vsel %vm898_vm11, %v742_v4, %v962_v12  ;;  %v1765_v22 = vpop.f32.mrb[6].mxu1  ;;  %v629_v23 = vpop.f32.mrb[7].mxu0  ;;  %vm903_vm13 = vcmp.ge.f32.partialorder %v763_v15, 0.0 }
  0xf4   : > { %v1625_v24 = vpack.c.bf16 %v994_v19, %v994_v19  ;;  %v1657_v25 = vpack.c.bf16 %v1026_v20, %v1026_v20  ;;  %v999_v26 = vsel %vm871_vm12, %v635_v8, %v935_v14  ;;  %v757_v27 = vpop.f32.mrb[7].mxu1  ;;  %v967_v29 = vmul.f32 0.01, %v763_v15 }
  0xf5   : > { %1349 = vst.msk [vmem:[%s2011_s29 + $0x8c] sm:$0xf] %vm1313_vm3, %v1659_v18  ;;  %v1630_v28 = vpack.c.bf16 %v999_v26, %v999_v26  ;;  %vm869_vm14 = vcmp.ge.f32.partialorder %v627_v21, 0.0  ;;  %v933_v30 = vmul.f32 0.01, %v627_v21  ;;  %v755_v31 = vadd.f32 %v1999_v38, %v754_v16 }
  0xf6   : > { %1315 = vst.msk [vmem:[%s2011_s29 + $0x4] sm:$0xf] %vm1313_vm3, %v1625_v24  ;;  %1347 = vst.msk [vmem:[%s2011_s29 + $0x84] sm:$0xf] %vm1313_vm3, %v1657_v25  ;;  %v638_v32 = vadd.f32 %v1733_v17, %v1999_v38  ;;  %v766_v33 = vadd.f32 %v1765_v22, %v1999_v38  ;;  %v630_v34 = vadd.f32 %v1999_v38, %v629_v23  ;;  %v1736_v39 = vpop.f32.mrb[8].mxu0 }
  0xf7   : > { %1320 = vst.msk [vmem:[%s2011_s29 + $0x18] sm:$0xf] %vm1313_vm3, %v1630_v28  ;;  %v1031_v35 = vsel %vm903_vm13, %v763_v15, %v967_v29  ;;  %v997_v36 = vsel %vm869_vm14, %v627_v21, %v933_v30  ;;  %v758_v37 = vadd.f32 %v1999_v38, %v757_v27  ;;  %vm901_vm15 = vcmp.ge.f32.partialorder %v755_v31, 0.0  ;;  %v1768_v43 = vpop.f32.mrb[8].mxu1  ;;  %v642_v44 = vpop.f32.mrb[9].mxu0 }
  0xf8   : > { %v1662_v40 = vpack.c.bf16 %v1031_v35, %v1031_v35  ;;  %v1628_v41 = vpack.c.bf16 %v997_v36, %v997_v36  ;;  %v965_v42 = vmul.f32 0.01, %v755_v31  ;;  %vm872_vm0 = vcmp.ge.f32.partialorder %v638_v32, 0.0  ;;  %v770_v49 = vpop.f32.mrb[9].mxu1  ;;  %v1737_v50 = vpop.f32.mrb[10].mxu0 }
  0xf9   : > { %v936_v45 = vmul.f32 0.01, %v638_v32  ;;  %vm904_vm1 = vcmp.ge.f32.partialorder %v766_v33, 0.0  ;;  %v968_v46 = vmul.f32 0.01, %v766_v33  ;;  %vm870_vm2 = vcmp.ge.f32.partialorder %v630_v34, 0.0 }
  0xfa   : > { %1352 = vst.msk [vmem:[%s2011_s29 + $0x98] sm:$0xf] %vm1313_vm3, %v1662_v40  ;;  %1318 = vst.msk [vmem:[%s2011_s29 + $0x10] sm:$0xf] %vm1313_vm3, %v1628_v41  ;;  %v1029_v47 = vsel %vm901_vm15, %v755_v31, %v965_v42  ;;  %v934_v48 = vmul.f32 0.01, %v630_v34  ;;  %v651_v60 = vadd.f32 %v1736_v39, %v1999_v38  ;;  %v779_v0 = vadd.f32 %v1768_v43, %v1999_v38 }
  0xfb   : > { %vm902_vm4 = vcmp.ge.f32.partialorder %v758_v37, 0.0  ;;  %v1660_v51 = vpack.c.bf16 %v1029_v47, %v1029_v47  ;;  %v1000_v52 = vsel %vm872_vm0, %v638_v32, %v936_v45  ;;  %v1032_v53 = vsel %vm904_vm1, %v766_v33, %v968_v46  ;;  %v1769_v55 = vpop.f32.mrb[10].mxu1  ;;  %v645_v56 = vpop.f32.mrb[11].mxu0 }
  0xfc   : > { %v966_v54 = vmul.f32 0.01, %v758_v37  ;;  %v1631_v57 = vpack.c.bf16 %v1000_v52, %v1000_v52  ;;  %v1663_v58 = vpack.c.bf16 %v1032_v53, %v1032_v53  ;;  %v998_v59 = vsel %vm870_vm2, %v630_v34, %v934_v48  ;;  %v773_v61 = vpop.f32.mrb[11].mxu1 }
  0xfd   : > { %1350 = vst.msk [vmem:[%s2011_s29 + $0x90] sm:$0xf] %vm1313_vm3, %v1660_v51  ;;  %v1629_v62 = vpack.c.bf16 %v998_v59, %v998_v59  ;;  %v643_v1 = vadd.f32 %v1999_v38, %v642_v44  ;;  %vm875_vm5 = vcmp.ge.f32.partialorder %v651_v60, 0.0  ;;  %v939_v3 = vmul.f32 0.01, %v651_v60 }
  0xfe   : > { %v1030_v63 = vsel %vm902_vm4, %v758_v37, %v966_v54  ;;  %1321 = vst.msk [vmem:[%s2011_s29 + $0x1c] sm:$0xf] %vm1313_vm3, %v1631_v57  ;;  %1353 = vst.msk [vmem:[%s2011_s29 + $0x9c] sm:$0xf] %vm1313_vm3, %v1663_v58  ;;  %v771_v4 = vadd.f32 %v1999_v38, %v770_v49  ;;  %vm907_vm6 = vcmp.ge.f32.partialorder %v779_v0, 0.0  ;;  %v654_v9 = vadd.f32 %v1737_v50, %v1999_v38  ;;  %v1740_v10 = vpop.f32.mrb[12].mxu0 }
  0xff   : > { %v1661_v2 = vpack.c.bf16 %v1030_v63, %v1030_v63  ;;  %1319 = vst.msk [vmem:[%s2011_s29 + $0x14] sm:$0xf] %vm1313_vm3, %v1629_v62  ;;  %v971_v5 = vmul.f32 0.01, %v779_v0  ;;  %vm873_vm7 = vcmp.ge.f32.partialorder %v643_v1, 0.0  ;;  %v1003_v7 = vsel %vm875_vm5, %v651_v60, %v939_v3  ;;  %v1772_v11 = vpop.f32.mrb[12].mxu1 }
 0x100   : > { %v937_v6 = vmul.f32 0.01, %v643_v1  ;;  %vm905_vm8 = vcmp.ge.f32.partialorder %v771_v4, 0.0  ;;  %v969_v8 = vmul.f32 0.01, %v771_v4  ;;  %v1634_v12 = vpack.c.bf16 %v1003_v7, %v1003_v7  ;;  %v658_v16 = vpop.f32.mrb[13].mxu0 }
 0x101   : > { %1351 = vst.msk [vmem:[%s2011_s29 + $0x94] sm:$0xf] %vm1313_vm3, %v1661_v2  ;;  %v1035_v13 = vsel %vm907_vm6, %v779_v0, %v971_v5  ;;  %v782_v15 = vadd.f32 %v1769_v55, %v1999_v38  ;;  %v786_v17 = vpop.f32.mrb[13].mxu1  ;;  %vm876_vm9 = vcmp.ge.f32.partialorder %v654_v9, 0.0  ;;  %v1741_v21 = vpop.f32.mrb[14].mxu0  ;;  %v646_v27 = vadd.f32 %v1999_v38, %v645_v56 }
 0x102   : > { %v1001_v14 = vsel %vm873_vm7, %v643_v1, %v937_v6  ;;  %v1666_v18 = vpack.c.bf16 %v1035_v13, %v1035_v13  ;;  %v1033_v20 = vsel %vm905_vm8, %v771_v4, %v969_v8  ;;  %v1773_v22 = vpop.f32.mrb[14].mxu1  ;;  %1324 = vst.msk [vmem:[%s2011_s29 + $0x28] sm:$0xf] %vm1313_vm3, %v1634_v12  ;;  %v940_v24 = vmul.f32 0.01, %v654_v9  ;;  %v661_v26 = vpop.f32.mrb[15].mxu0 }
 0x103   : > { %v1632_v19 = vpack.c.bf16 %v1001_v14, %v1001_v14  ;;  %v1664_v23 = vpack.c.bf16 %v1033_v20, %v1033_v20  ;;  %vm908_vm10 = vcmp.ge.f32.partialorder %v782_v15, 0.0  ;;  %v972_v25 = vmul.f32 0.01, %v782_v15  ;;  %v789_v31 = vpop.f32.mrb[15].mxu1 }
 0x104   : > { %1356 = vst.msk [vmem:[%s2011_s29 + $0xa8] sm:$0xf] %vm1313_vm3, %v1666_v18  ;;  %v774_v28 = vadd.f32 %v1999_v38, %v773_v61  ;;  %v667_v29 = vadd.f32 %v1740_v10, %v1999_v38  ;;  %v795_v30 = vadd.f32 %v1772_v11, %v1999_v38  ;;  %v1004_v32 = vsel %vm876_vm9, %v654_v9, %v940_v24 }
 0x105   : > { %1322 = vst.msk [vmem:[%s2011_s29 + $0x20] sm:$0xf] %vm1313_vm3, %v1632_v19  ;;  %1354 = vst.msk [vmem:[%s2011_s29 + $0xa0] sm:$0xf] %vm1313_vm3, %v1664_v23  ;;  %v1036_v33 = vsel %vm908_vm10, %v782_v15, %v972_v25  ;;  %v659_v34 = vadd.f32 %v1999_v38, %v658_v16  ;;  %v787_v35 = vadd.f32 %v1999_v38, %v786_v17  ;;  %vm874_vm11 = vcmp.ge.f32.partialorder %v646_v27, 0.0 }
 0x106   : > { %v1635_v36 = vpack.c.bf16 %v1004_v32, %v1004_v32  ;;  %v1667_v37 = vpack.c.bf16 %v1036_v33, %v1036_v33  ;;  %v938_v39 = vmul.f32 0.01, %v646_v27  ;;  %vm906_vm12 = vcmp.ge.f32.partialorder %v774_v28, 0.0  ;;  %v1744_v44 = vpop.f32.mrb[16].mxu0 }
 0x107   : > { %v970_v40 = vmul.f32 0.01, %v774_v28  ;;  %vm879_vm13 = vcmp.ge.f32.partialorder %v667_v29, 0.0  ;;  %v943_v41 = vmul.f32 0.01, %v667_v29  ;;  %vm911_vm14 = vcmp.ge.f32.partialorder %v795_v30, 0.0 }
 0x108   : > { %1325 = vst.msk [vmem:[%s2011_s29 + $0x2c] sm:$0xf] %vm1313_vm3, %v1635_v36  ;;  %1357 = vst.msk [vmem:[%s2011_s29 + $0xac] sm:$0xf] %vm1313_vm3, %v1667_v37  ;;  %v1002_v42 = vsel %vm874_vm11, %v646_v27, %v938_v39  ;;  %v975_v43 = vmul.f32 0.01, %v795_v30  ;;  %v670_v60 = vadd.f32 %v1741_v21, %v1999_v38  ;;  %v798_v0 = vadd.f32 %v1773_v22, %v1999_v38 }
 0x109   : > { %vm877_vm15 = vcmp.ge.f32.partialorder %v659_v34, 0.0  ;;  %v1776_v45 = vpop.f32.mrb[16].mxu1  ;;  %v1633_v46 = vpack.c.bf16 %v1002_v42, %v1002_v42  ;;  %v1034_v47 = vsel %vm906_vm12, %v774_v28, %v970_v40  ;;  %v1007_v48 = vsel %vm879_vm13, %v667_v29, %v943_v41  ;;  %v674_v50 = vpop.f32.mrb[17].mxu0 }
 0x10a   : > { %v941_v49 = vmul.f32 0.01, %v659_v34  ;;  %v802_v51 = vpop.f32.mrb[17].mxu1  ;;  %v1665_v52 = vpack.c.bf16 %v1034_v47, %v1034_v47  ;;  %v1638_v53 = vpack.c.bf16 %v1007_v48, %v1007_v48  ;;  %v1039_v54 = vsel %vm911_vm14, %v795_v30, %v975_v43  ;;  %v1745_v55 = vpop.f32.mrb[18].mxu0 }
 0x10b   : > { %vm909_vm0 = vcmp.ge.f32.partialorder %v787_v35, 0.0  ;;  %v1777_v56 = vpop.f32.mrb[18].mxu1  ;;  %1323 = vst.msk [vmem:[%s2011_s29 + $0x24] sm:$0xf] %vm1313_vm3, %v1633_v46  ;;  %v1670_v57 = vpack.c.bf16 %v1039_v54, %v1039_v54  ;;  %v973_v59 = vmul.f32 0.01, %v787_v35  ;;  %v662_v1 = vadd.f32 %v1999_v38, %v661_v26 }
 0x10c   : > { %v1005_v58 = vsel %vm877_vm15, %v659_v34, %v941_v49  ;;  %v677_v61 = vpop.f32.mrb[19].mxu0  ;;  %v2086_v62 = vpop.f32.mrb[19].mxu1  ;;  %1355 = vst.msk [vmem:[%s2011_s29 + $0xa4] sm:$0xf] %vm1313_vm3, %v1665_v52  ;;  %1328 = vst.msk [vmem:[%s2011_s29 + $0x38] sm:$0xf] %vm1313_vm3, %v1638_v53  ;;  %v790_v2 = vadd.f32 %v1999_v38, %v789_v31  ;;  %v683_v5 = vadd.f32 %v1744_v44, %v1999_v38 }
 0x10d   : > { %v1636_v63 = vpack.c.bf16 %v1005_v58, %v1005_v58  ;;  %1360 = vst.msk [vmem:[%s2011_s29 + $0xb8] sm:$0xf] %vm1313_vm3, %v1670_v57  ;;  %v1037_v3 = vsel %vm909_vm0, %v787_v35, %v973_v59  ;;  %vm880_vm1 = vcmp.ge.f32.partialorder %v670_v60, 0.0  ;;  %v944_v4 = vmul.f32 0.01, %v670_v60 }
 0x10e   : > { %v1668_v6 = vpack.c.bf16 %v1037_v3, %v1037_v3  ;;  %vm912_vm2 = vcmp.ge.f32.partialorder %v798_v0, 0.0  ;;  %v976_v7 = vmul.f32 0.01, %v798_v0  ;;  %vm878_vm4 = vcmp.ge.f32.partialorder %v662_v1, 0.0  ;;  %v1748_v11 = vpop.f32.mrb[20].mxu0 }
 0x10f   : > { %1326 = vst.msk [vmem:[%s2011_s29 + $0x30] sm:$0xf] %vm1313_vm3, %v1636_v63  ;;  %v1008_v8 = vsel %vm880_vm1, %v670_v60, %v944_v4  ;;  %v942_v9 = vmul.f32 0.01, %v662_v1  ;;  %vm910_vm5 = vcmp.ge.f32.partialorder %v790_v2, 0.0  ;;  %vm883_vm6 = vcmp.ge.f32.partialorder %v683_v5, 0.0 }
 0x110   : > { %v974_v10 = vmul.f32 0.01, %v790_v2  ;;  %1358 = vst.msk [vmem:[%s2011_s29 + $0xb0] sm:$0xf] %vm1313_vm3, %v1668_v6  ;;  %v1639_v12 = vpack.c.bf16 %v1008_v8, %v1008_v8  ;;  %v1040_v13 = vsel %vm912_vm2, %v798_v0, %v976_v7  ;;  %v947_v14 = vmul.f32 0.01, %v683_v5 }
 0x111   : > { %v1780_v15 = vpop.f32.mrb[20].mxu1  ;;  %v690_v16 = vpop.f32.mrb[21].mxu0  ;;  %v1671_v17 = vpack.c.bf16 %v1040_v13, %v1040_v13  ;;  %v1006_v18 = vsel %vm878_vm4, %v662_v1, %v942_v9  ;;  %v811_v20 = vadd.f32 %v1776_v45, %v1999_v38  ;;  %v675_v26 = vadd.f32 %v1999_v38, %v674_v50 }
 0x112   : > { %v1038_v19 = vsel %vm910_vm5, %v790_v2, %v974_v10  ;;  %v2104_v21 = vpop.f32.mrb[21].mxu1  ;;  %v2106_v22 = vpop.f32.mrb[22].mxu0  ;;  %1329 = vst.msk [vmem:[%s2011_s29 + $0x3c] sm:$0xf] %vm1313_vm3, %v1639_v12  ;;  %v1637_v23 = vpack.c.bf16 %v1006_v18, %v1006_v18  ;;  %v1011_v25 = vsel %vm883_vm6, %v683_v5, %v947_v14  ;;  %v803_v31 = vadd.f32 %v1999_v38, %v802_v51 }
 0x113   : > { %v1669_v24 = vpack.c.bf16 %v1038_v19, %v1038_v19  ;;  %v2111_v27 = vpop.f32.mrb[22].mxu1  ;;  %v2113_v28 = vpop.f32.mrb[23].mxu0  ;;  %1361 = vst.msk [vmem:[%s2011_s29 + $0xbc] sm:$0xf] %vm1313_vm3, %v1671_v17  ;;  %v1642_v29 = vpack.c.bf16 %v1011_v25, %v1011_v25  ;;  %vm915_vm7 = vcmp.ge.f32.partialorder %v811_v20, 0.0  ;;  %vm881_vm8 = vcmp.ge.f32.partialorder %v675_v26, 0.0 }
 0x114   : > { %v979_v30 = vmul.f32 0.01, %v811_v20  ;;  %v2118_v32 = vpop.f32.mrb[23].mxu1  ;;  %1327 = vst.msk [vmem:[%s2011_s29 + $0x34] sm:$0xf] %vm1313_vm3, %v1637_v23  ;;  %v686_v34 = vadd.f32 %v1745_v55, %v1999_v38  ;;  %v814_v35 = vadd.f32 %v1777_v56, %v1999_v38  ;;  %vm913_vm9 = vcmp.ge.f32.partialorder %v803_v31, 0.0 }
 0x115   : > { %1359 = vst.msk [vmem:[%s2011_s29 + $0xb4] sm:$0xf] %vm1313_vm3, %v1669_v24  ;;  %v945_v33 = vmul.f32 0.01, %v675_v26  ;;  %1332 = vst.msk [vmem:[%s2011_s29 + $0x48] sm:$0xf] %vm1313_vm3, %v1642_v29  ;;  %v678_v39 = vadd.f32 %v1999_v38, %v677_v61  ;;  %v806_v54 = vadd.f32 %v1999_v38, %v2086_v62  ;;  %v699_v55 = vadd.f32 %v1748_v11, %v1999_v38 }
 0x116   : > { %v1043_v36 = vsel %vm915_vm7, %v811_v20, %v979_v30  ;;  %v977_v37 = vmul.f32 0.01, %v803_v31  ;;  %vm884_vm10 = vcmp.ge.f32.partialorder %v686_v34, 0.0  ;;  %v948_v42 = vmul.f32 0.01, %v686_v34  ;;  %v2129_v46 = vpop.f32.mrb[24].mxu0 }
 0x117   : > { %v1674_v40 = vpack.c.bf16 %v1043_v36, %v1043_v36  ;;  %v1009_v41 = vsel %vm881_vm8, %v675_v26, %v945_v33  ;;  %vm916_vm11 = vcmp.ge.f32.partialorder %v814_v35, 0.0  ;;  %v980_v45 = vmul.f32 0.01, %v814_v35  ;;  %v1784_v50 = vpop.f32.mrb[24].mxu1  ;;  %v2133_v51 = vpop.f32.mrb[25].mxu0 }
 0x118   : > { %v1640_v43 = vpack.c.bf16 %v1009_v41, %v1009_v41  ;;  %v1041_v44 = vsel %vm913_vm9, %v803_v31, %v977_v37  ;;  %v1012_v48 = vsel %vm884_vm10, %v686_v34, %v948_v42  ;;  %vm882_vm12 = vcmp.ge.f32.partialorder %v678_v39, 0.0  ;;  %v2140_v56 = vpop.f32.mrb[25].mxu1  ;;  %v2142_v57 = vpop.f32.mrb[26].mxu0 }
 0x119   : > { %1364 = vst.msk [vmem:[%s2011_s29 + $0xc8] sm:$0xf] %vm1313_vm3, %v1674_v40  ;;  %v1672_v47 = vpack.c.bf16 %v1041_v44, %v1041_v44  ;;  %v946_v49 = vmul.f32 0.01, %v678_v39  ;;  %v1643_v52 = vpack.c.bf16 %v1012_v48, %v1012_v48  ;;  %v1044_v53 = vsel %vm916_vm11, %v814_v35, %v980_v45  ;;  %v2148_v63 = vpop.f32.mrb[26].mxu1  ;;  %v2150_v0 = vpop.f32.mrb[27].mxu0 }
 0x11a   : > { %1330 = vst.msk [vmem:[%s2011_s29 + $0x40] sm:$0xf] %vm1313_vm3, %v1640_v43  ;;  %v1675_v58 = vpack.c.bf16 %v1044_v53, %v1044_v53  ;;  %v827_v60 = vadd.f32 %v1780_v15, %v1999_v38  ;;  %v691_v61 = vadd.f32 %v1999_v38, %v690_v16  ;;  %vm914_vm13 = vcmp.ge.f32.partialorder %v806_v54, 0.0  ;;  %v2154_v2 = vpop.f32.mrb[27].mxu1 }
 0x11b   : > { %1362 = vst.msk [vmem:[%s2011_s29 + $0xc0] sm:$0xf] %vm1313_vm3, %v1672_v47  ;;  %v1010_v59 = vsel %vm882_vm12, %v678_v39, %v946_v49  ;;  %1333 = vst.msk [vmem:[%s2011_s29 + $0x4c] sm:$0xf] %vm1313_vm3, %v1643_v52  ;;  %v978_v1 = vmul.f32 0.01, %v806_v54  ;;  %v819_v7 = vadd.f32 %v1999_v38, %v2104_v21  ;;  %v702_v8 = vadd.f32 %v2106_v22, %v1999_v38 }
 0x11c   : > { %v1641_v62 = vpack.c.bf16 %v1010_v59, %v1010_v59  ;;  %vm887_vm14 = vcmp.ge.f32.partialorder %v699_v55, 0.0  ;;  %1365 = vst.msk [vmem:[%s2011_s29 + $0xcc] sm:$0xf] %vm1313_vm3, %v1675_v58  ;;  %v951_v3 = vmul.f32 0.01, %v699_v55  ;;  %vm919_vm15 = vcmp.ge.f32.partialorder %v827_v60, 0.0 }
 0x11d   : > { %v983_v4 = vmul.f32 0.01, %v827_v60  ;;  %vm885_vm0 = vcmp.ge.f32.partialorder %v691_v61, 0.0  ;;  %v1042_v5 = vsel %vm914_vm13, %v806_v54, %v978_v1  ;;  %v949_v6 = vmul.f32 0.01, %v691_v61 }
 0x11e   : > { %1331 = vst.msk [vmem:[%s2011_s29 + $0x44] sm:$0xf] %vm1313_vm3, %v1641_v62  ;;  %v1673_v9 = vpack.c.bf16 %v1042_v5, %v1042_v5  ;;  %v1015_v10 = vsel %vm887_vm14, %v699_v55, %v951_v3  ;;  %v830_v12 = vadd.f32 %v2111_v27, %v1999_v38  ;;  %vm917_vm1 = vcmp.ge.f32.partialorder %v819_v7, 0.0  ;;  %v1756_v16 = vpop.f32.mrb[28].mxu0 }
 0x11f   : > { %v1047_v11 = vsel %vm919_vm15, %v827_v60, %v983_v4  ;;  %v1646_v13 = vpack.c.bf16 %v1015_v10, %v1015_v10  ;;  %v1013_v15 = vsel %vm885_vm0, %v691_v61, %v949_v6  ;;  %v981_v18 = vmul.f32 0.01, %v819_v7  ;;  %v2168_v20 = vpop.f32.mrb[28].mxu1  ;;  %v2178_v24 = vpop.f32.mrb[29].mxu0 }
 0x120   : > { %v1678_v14 = vpack.c.bf16 %v1047_v11, %v1047_v11  ;;  %1363 = vst.msk [vmem:[%s2011_s29 + $0xc4] sm:$0xf] %vm1313_vm3, %v1673_v9  ;;  %v1644_v17 = vpack.c.bf16 %v1013_v15, %v1013_v15  ;;  %vm888_vm2 = vcmp.ge.f32.partialorder %v702_v8, 0.0  ;;  %v952_v19 = vmul.f32 0.01, %v702_v8  ;;  %v2180_v25 = vpop.f32.mrb[29].mxu1 }
 0x121   : > { %1336 = vst.msk [vmem:[%s2011_s29 + $0x58] sm:$0xf] %vm1313_vm3, %v1646_v13  ;;  %vm920_vm4 = vcmp.ge.f32.partialorder %v830_v12, 0.0  ;;  %v984_v21 = vmul.f32 0.01, %v830_v12  ;;  %v694_v22 = vadd.f32 %v1999_v38, %v2113_v28  ;;  %v822_v23 = vadd.f32 %v1999_v38, %v2118_v32  ;;  %v2188_v28 = vpop.f32.mrb[30].mxu0 }
 0x122   : > { %1368 = vst.msk [vmem:[%s2011_s29 + $0xd8] sm:$0xf] %vm1313_vm3, %v1678_v14  ;;  %1334 = vst.msk [vmem:[%s2011_s29 + $0x50] sm:$0xf] %vm1313_vm3, %v1644_v17  ;;  %v1045_v26 = vsel %vm917_vm1, %v819_v7, %v981_v18  ;;  %v1016_v27 = vsel %vm888_vm2, %v702_v8, %v952_v19  ;;  %v715_v29 = vadd.f32 %v2129_v46, %v1999_v38  ;;  %v2190_v31 = vpop.f32.mrb[30].mxu1  ;;  %v2192_v35 = vpop.f32.mrb[31].mxu0 }
 0x123   : > { %v843_v30 = vadd.f32 %v1784_v50, %v1999_v38  ;;  %v1676_v32 = vpack.c.bf16 %v1045_v26, %v1045_v26  ;;  %v1647_v33 = vpack.c.bf16 %v1016_v27, %v1016_v27  ;;  %v1048_v34 = vsel %vm920_vm4, %v830_v12, %v984_v21  ;;  %v2194_v36 = vpop.f32.mrb[31].mxu1 }
 0x124   : > { %vm886_vm5 = vcmp.ge.f32.partialorder %v694_v22, 0.0  ;;  %v1679_v37 = vpack.c.bf16 %v1048_v34, %v1048_v34  ;;  %v950_v39 = vmul.f32 0.01, %v694_v22  ;;  %vm918_vm6 = vcmp.ge.f32.partialorder %v822_v23, 0.0 }
 0x125   : > { %v982_v40 = vmul.f32 0.01, %v822_v23  ;;  %1366 = vst.msk [vmem:[%s2011_s29 + $0xd0] sm:$0xf] %vm1313_vm3, %v1676_v32  ;;  %1337 = vst.msk [vmem:[%s2011_s29 + $0x5c] sm:$0xf] %vm1313_vm3, %v1647_v33  ;;  %v707_v45 = vadd.f32 %v1999_v38, %v2133_v51  ;;  %v835_v46 = vadd.f32 %v1999_v38, %v2140_v56  ;;  %v718_v51 = vadd.f32 %v2142_v57, %v1999_v38 }
 0x126   : > { %vm891_vm7 = vcmp.ge.f32.partialorder %v715_v29, 0.0  ;;  %v955_v41 = vmul.f32 0.01, %v715_v29  ;;  %vm923_vm8 = vcmp.ge.f32.partialorder %v843_v30, 0.0  ;;  %v987_v42 = vmul.f32 0.01, %v843_v30 }
 0x127   : > { %1369 = vst.msk [vmem:[%s2011_s29 + $0xdc] sm:$0xf] %vm1313_vm3, %v1679_v37  ;;  %v1014_v43 = vsel %vm886_vm5, %v694_v22, %v950_v39  ;;  %v1046_v44 = vsel %vm918_vm6, %v822_v23, %v982_v40  ;;  %vm889_vm9 = vcmp.ge.f32.partialorder %v707_v45, 0.0  ;;  %v953_v54 = vmul.f32 0.01, %v707_v45 }
 0x128   : > { %v1645_v47 = vpack.c.bf16 %v1014_v43, %v1014_v43  ;;  %v1677_v48 = vpack.c.bf16 %v1046_v44, %v1046_v44  ;;  %v1019_v49 = vsel %vm891_vm7, %v715_v29, %v955_v41  ;;  %v1051_v50 = vsel %vm923_vm8, %v843_v30, %v987_v42 }
 0x129   : > { %v1650_v52 = vpack.c.bf16 %v1019_v49, %v1019_v49  ;;  %v1682_v53 = vpack.c.bf16 %v1051_v50, %v1051_v50  ;;  %vm921_vm10 = vcmp.ge.f32.partialorder %v835_v46, 0.0  ;;  %v985_v55 = vmul.f32 0.01, %v835_v46 }
 0x12a   : > { %1335 = vst.msk [vmem:[%s2011_s29 + $0x54] sm:$0xf] %vm1313_vm3, %v1645_v47  ;;  %1367 = vst.msk [vmem:[%s2011_s29 + $0xd4] sm:$0xf] %vm1313_vm3, %v1677_v48  ;;  %v846_v56 = vadd.f32 %v2148_v63, %v1999_v38  ;;  %v1017_v58 = vsel %vm889_vm9, %v707_v45, %v953_v54  ;;  %v710_v59 = vadd.f32 %v1999_v38, %v2150_v0  ;;  %vm892_vm11 = vcmp.ge.f32.partialorder %v718_v51, 0.0 }
 0x12b   : > { %1340 = vst.msk [vmem:[%s2011_s29 + $0x68] sm:$0xf] %vm1313_vm3, %v1650_v52  ;;  %1372 = vst.msk [vmem:[%s2011_s29 + $0xe8] sm:$0xf] %vm1313_vm3, %v1682_v53  ;;  %v838_v60 = vadd.f32 %v1999_v38, %v2154_v2  ;;  %v731_v61 = vadd.f32 %v1756_v16, %v1999_v38  ;;  %v1648_v62 = vpack.c.bf16 %v1017_v58, %v1017_v58  ;;  %v956_v1 = vmul.f32 0.01, %v718_v51 }
 0x12c   : > { %v1049_v57 = vsel %vm921_vm10, %v835_v46, %v985_v55  ;;  %vm924_vm12 = vcmp.ge.f32.partialorder %v846_v56, 0.0  ;;  %v988_v63 = vmul.f32 0.01, %v846_v56  ;;  %vm890_vm13 = vcmp.ge.f32.partialorder %v710_v59, 0.0 }
 0x12d   : > { %v1680_v3 = vpack.c.bf16 %v1049_v57, %v1049_v57  ;;  %1338 = vst.msk [vmem:[%s2011_s29 + $0x60] sm:$0xf] %vm1313_vm3, %v1648_v62  ;;  %v1020_v4 = vsel %vm892_vm11, %v718_v51, %v956_v1  ;;  %v954_v5 = vmul.f32 0.01, %v710_v59  ;;  %vm922_vm14 = vcmp.ge.f32.partialorder %v838_v60, 0.0 }
 0x12e   : > { %v986_v0 = vmul.f32 0.01, %v838_v60  ;;  %v1651_v2 = vpack.c.bf16 %v1020_v4, %v1020_v4  ;;  %v1052_v6 = vsel %vm924_vm12, %v846_v56, %v988_v63  ;;  %vm895_vm15 = vcmp.ge.f32.partialorder %v731_v61, 0.0 }
 0x12f   : > { %1370 = vst.msk [vmem:[%s2011_s29 + $0xe0] sm:$0xf] %vm1313_vm3, %v1680_v3  ;;  %v959_v7 = vmul.f32 0.01, %v731_v61  ;;  %v1683_v8 = vpack.c.bf16 %v1052_v6, %v1052_v6  ;;  %v1018_v9 = vsel %vm890_vm13, %v710_v59, %v954_v5  ;;  %v859_v11 = vadd.f32 %v2168_v20, %v1999_v38 }
 0x130   : > { %v1050_v10 = vsel %vm922_vm14, %v838_v60, %v986_v0  ;;  %1341 = vst.msk [vmem:[%s2011_s29 + $0x6c] sm:$0xf] %vm1313_vm3, %v1651_v2  ;;  %v1649_v12 = vpack.c.bf16 %v1018_v9, %v1018_v9  ;;  %v723_v15 = vadd.f32 %v1999_v38, %v2178_v24  ;;  %v851_v18 = vadd.f32 %v1999_v38, %v2180_v25 }
 0x131   : > { %v1681_v13 = vpack.c.bf16 %v1050_v10, %v1050_v10  ;;  %v1023_v14 = vsel %vm895_vm15, %v731_v61, %v959_v7  ;;  %1373 = vst.msk [vmem:[%s2011_s29 + $0xec] sm:$0xf] %vm1313_vm3, %v1683_v8  ;;  %vm927_vm0 = vcmp.ge.f32.partialorder %v859_v11, 0.0  ;;  %v991_v17 = vmul.f32 0.01, %v859_v11 }
 0x132   : > { %v1654_v16 = vpack.c.bf16 %v1023_v14, %v1023_v14  ;;  %1339 = vst.msk [vmem:[%s2011_s29 + $0x64] sm:$0xf] %vm1313_vm3, %v1649_v12  ;;  %vm893_vm1 = vcmp.ge.f32.partialorder %v723_v15, 0.0  ;;  %v957_v19 = vmul.f32 0.01, %v723_v15  ;;  %v734_v20 = vadd.f32 %v2188_v28, %v1999_v38 }
 0x133   : > { %1371 = vst.msk [vmem:[%s2011_s29 + $0xe4] sm:$0xf] %vm1313_vm3, %v1681_v13  ;;  %v862_v21 = vadd.f32 %v2190_v31, %v1999_v38  ;;  %v1055_v22 = vsel %vm927_vm0, %v859_v11, %v991_v17  ;;  %vm925_vm2 = vcmp.ge.f32.partialorder %v851_v18, 0.0  ;;  %v989_v23 = vmul.f32 0.01, %v851_v18 }
 0x134   : > { %1344 = vst.msk [vmem:[%s2011_s29 + $0x78] sm:$0xf] %vm1313_vm3, %v1654_v16  ;;  %v726_v24 = vadd.f32 %v1999_v38, %v2192_v35  ;;  %v1686_v25 = vpack.c.bf16 %v1055_v22, %v1055_v22  ;;  %v1021_v26 = vsel %vm893_vm1, %v723_v15, %v957_v19  ;;  %vm896_vm4 = vcmp.ge.f32.partialorder %v734_v20, 0.0 }
 0x135   : > { %v960_v27 = vmul.f32 0.01, %v734_v20  ;;  %v1652_v29 = vpack.c.bf16 %v1021_v26, %v1021_v26  ;;  %v1053_v30 = vsel %vm925_vm2, %v851_v18, %v989_v23  ;;  %vm928_vm5 = vcmp.ge.f32.partialorder %v862_v21, 0.0 }
 0x136   : > { %v992_v28 = vmul.f32 0.01, %v862_v21  ;;  %1376 = vst.msk [vmem:[%s2011_s29 + $0xf8] sm:$0xf] %vm1313_vm3, %v1686_v25  ;;  %v1684_v31 = vpack.c.bf16 %v1053_v30, %v1053_v30  ;;  %vm894_vm6 = vcmp.ge.f32.partialorder %v726_v24, 0.0  ;;  %v854_v37 = vadd.f32 %v1999_v38, %v2194_v36 }
 0x137   : > { %v1024_v32 = vsel %vm896_vm4, %v734_v20, %v960_v27  ;;  %v958_v33 = vmul.f32 0.01, %v726_v24  ;;  %1342 = vst.msk [vmem:[%s2011_s29 + $0x70] sm:$0xf] %vm1313_vm3, %v1652_v29 }
 0x138   : > { %v1655_v34 = vpack.c.bf16 %v1024_v32, %v1024_v32  ;;  %v1056_v35 = vsel %vm928_vm5, %v862_v21, %v992_v28  ;;  %1374 = vst.msk [vmem:[%s2011_s29 + $0xf0] sm:$0xf] %vm1313_vm3, %v1684_v31  ;;  %vm926_vm7 = vcmp.ge.f32.partialorder %v854_v37, 0.0  ;;  %v990_v42 = vmul.f32 0.01, %v854_v37 }
 0x139   : > { %v1687_v39 = vpack.c.bf16 %v1056_v35, %v1056_v35  ;;  %v1022_v40 = vsel %vm894_vm6, %v726_v24, %v958_v33 }
 0x13a   : > { %1345 = vst.msk [vmem:[%s2011_s29 + $0x7c] sm:$0xf] %vm1313_vm3, %v1655_v34  ;;  %v1653_v41 = vpack.c.bf16 %v1022_v40, %v1022_v40  ;;  %v1054_v43 = vsel %vm926_vm7, %v854_v37, %v990_v42 }
 0x13b   : > { %1377 = vst.msk [vmem:[%s2011_s29 + $0xfc] sm:$0xf] %vm1313_vm3, %v1687_v39  ;;  %v1685_v44 = vpack.c.bf16 %v1054_v43, %v1054_v43 }
 0x13c   : > { %1343 = vst.msk [vmem:[%s2011_s29 + $0x74] sm:$0xf] %vm1313_vm3, %v1653_v41 }
 0x13d   : > { %1375 = vst.msk [vmem:[%s2011_s29 + $0xf4] sm:$0xf] %vm1313_vm3, %v1685_v44 }
 0x13e PF: > { %s13_s14 = sadd.s32 1, %s1875_s14   ;;  %s2278_s12 = smov %s1871_s13 }
 0x13f   : > { %p10_p5 = scmp.ge.s32.totalorder %s13_s14, 6   ;;  %s2279_s13 = smov %s2281_s15 }
 0x141   :  { %12 = sbr.rel (!%p10_p5) target bundleno = 2 (0x2), region = 68 }

</bundles_post_ra>
